<compile_context>
chip_gen: v7x
topology: tpu7x:2x2x1
jax: 0.10.0
libtpu: 0.0.40
codegen_flags: <defaults>
</compile_context>

<pallas_src>
import functools

import jax
import jax.numpy as jnp
from jax.experimental import pallas as pl
from jax.experimental.pallas import tpu as pltpu

_OUT_DIM = 2                              # final MLP layer width
_W3_PAD = 128                             # lane-dense padded width (decoder only)
_FUSED_VMEM_BUDGET = 32 * 1024 * 1024     # above this, use the tiled encoder


# ---------------------------------------------------------------------------
# Fused encoder kernel (small graphs): A_hat resident across all 3 layers.
# Each layer:  h <- act( (A_hat @ h) @ W + b )
# ---------------------------------------------------------------------------
def _gcn_encoder_fused_kernel(a_ref, x_ref,
                              w1_ref, b1_ref,
                              w2_ref, b2_ref,
                              w3_ref, b3_ref,
                              z_ref):
    a = a_ref[...]                                            # (N, N) bf16

    def layer(h_bf16, w_ref, b_ref, relu):
        # (A @ H) @ W: the dominant N^2 matmul runs over d_in columns only.
        ah = jnp.dot(a, h_bf16, preferred_element_type=jnp.float32)
        out = jnp.dot(ah.astype(w_ref.dtype), w_ref[...],
                      preferred_element_type=jnp.float32) + b_ref[...]
        return jnp.maximum(out, 0.0) if relu else out

    h = layer(x_ref[...], w1_ref, b1_ref, True)
    h = layer(h.astype(a.dtype), w2_ref, b2_ref, True)
    h = layer(h.astype(a.dtype), w3_ref, b3_ref, False)
    z_ref[...] = h.astype(z_ref.dtype)                        # bf16 store


def _fused_encoder_vmem_bytes(n, in_ch, hidden):
    a = n * n * 2
    x = n * in_ch * 2
    w = (in_ch * hidden + 2 * hidden * hidden) * 2 + 3 * hidden * 4
    z = n * hidden * 2
    inter = n * (2 * hidden + max(in_ch, hidden)) * 4         # f32 intermediates
    # factor 2: Pallas may double-buffer even full-array blocks.
    return 2 * (a + x + w + z) + inter


def _gcn_encoder_fused_call(x, a_hat, prep, z_dtype, vmem_est):
    n_nodes, in_ch = x.shape
    hidden = prep["w1"].shape[1]
    full = lambda shape: pl.BlockSpec(shape, lambda i: (0, 0))
    # Explicit scoped-VMEM budget: sized from the inputs (+ margin), clamped so
    # it is legal on every generation (v5e/v6e default 16/32 MiB, v7x 64 MiB
    # physical).  The fused path is only chosen when vmem_est <= 32 MiB.
    vmem_limit = int(min(48 << 20, max(16 << 20, vmem_est * 5 // 4 + (4 << 20))))
    return pl.pallas_call(
        _gcn_encoder_fused_kernel,
        out_shape=jax.ShapeDtypeStruct((n_nodes, hidden), z_dtype),
        grid_spec=pltpu.PrefetchScalarGridSpec(
            num_scalar_prefetch=0,
            grid=(1,),
            in_specs=[
                full((n_nodes, n_nodes)),                      # A_hat
                full((n_nodes, in_ch)),                        # X
                full((in_ch, hidden)),  full((1, hidden)),     # W1, b1
                full((hidden, hidden)), full((1, hidden)),     # W2, b2
                full((hidden, hidden)), full((1, hidden)),     # W3, b3
            ],
            out_specs=full((n_nodes, hidden)),
        ),
        compiler_params=pltpu.CompilerParams(
            dimension_semantics=("arbitrary",),
            vmem_limit_bytes=vmem_limit),
    )(a_hat, x, prep["w1"], prep["b1"], prep["w2"], prep["b2"],
      prep["w3"], prep["b3"])


# ---------------------------------------------------------------------------
# Tiled encoder (one pallas_call per GCN layer, larger graphs):
#   grid = (row tiles [parallel], K tiles [arbitrary])
#   acc += A[i,k] @ H[k]      (f32 scratch)
#   on last k:  out[i] = act(acc @ W + b)
# ---------------------------------------------------------------------------
def _gcn_layer_kernel(a_ref, h_ref, w_ref, b_ref, out_ref, acc_ref, *, relu):
    k = pl.program_id(1)

    @pl.when(k == 0)
    def _():
        acc_ref[...] = jnp.zeros_like(acc_ref)

    acc_ref[...] += jnp.dot(a_ref[...], h_ref[...],
                            preferred_element_type=jnp.float32)

    @pl.when(k == pl.num_programs(1) - 1)
    def _():
        out = jnp.dot(acc_ref[...].astype(w_ref.dtype), w_ref[...],
                      preferred_element_type=jnp.float32) + b_ref[...]
        if relu:
            out = jnp.maximum(out, 0.0)
        out_ref[...] = out.astype(out_ref.dtype)


def _pick_k_tile(n, target):
    """Largest multiple-of-128 K-tile <= target that divides n, else full n.

    The K axis is a reduction, so out-of-range (padded) K blocks must never be
    accumulated -> the tile has to divide n exactly.
    """
    if n <= target:
        return n
    t = (target // 128) * 128
    while t >= 128:
        if n % t == 0:
            return t
        t -= 128
    return n  # fallback: no K tiling (full row of A per step)


def _gcn_layer_call(a_hat, h, w, b, *, relu, out_dtype, block_m, block_k):
    n = a_hat.shape[0]
    d_in = h.shape[1]
    d_out = w.shape[1]
    tm = min(block_m, n)                       # ragged last row block is OK
    tk = _pick_k_tile(n, block_k)
    grid = (pl.cdiv(n, tm), n // tk)

    kernel = functools.partial(_gcn_layer_kernel, relu=relu)
    return pl.pallas_call(
        kernel,
        out_shape=jax.ShapeDtypeStruct((n, d_out), out_dtype),
        grid_spec=pltpu.PrefetchScalarGridSpec(
            num_scalar_prefetch=0,
            grid=grid,
            in_specs=[
                pl.BlockSpec((tm, tk), lambda i, k: (i, k)),      # A tile
                pl.BlockSpec((tk, d_in), lambda i, k: (k, 0)),    # H K-tile
                pl.BlockSpec((d_in, d_out), lambda i, k: (0, 0)),  # W
                pl.BlockSpec((1, d_out), lambda i, k: (0, 0)),     # b
            ],
            out_specs=pl.BlockSpec((tm, d_out), lambda i, k: (i, 0)),
            scratch_shapes=[pltpu.VMEM((tm, d_in), jnp.float32)],
        ),
        compiler_params=pltpu.CompilerParams(
            dimension_semantics=("parallel", "arbitrary")),
    )(a_hat, h, w, b)


def _gcn_encoder_tiled(a_hat, x, prep, z_dtype, block_m, block_k):
    # TODO(synk): this re-streams A_hat once per layer; for graphs where A fits
    # in VMEM the fused path above keeps it resident instead.
    h = _gcn_layer_call(a_hat, x, prep["w1"], prep["b1"], relu=True,
                        out_dtype=jnp.bfloat16, block_m=block_m, block_k=block_k)
    h = _gcn_layer_call(a_hat, h, prep["w2"], prep["b2"], relu=True,
                        out_dtype=jnp.bfloat16, block_m=block_m, block_k=block_k)
    return _gcn_layer_call(a_hat, h, prep["w3"], prep["b3"], relu=False,
                           out_dtype=z_dtype, block_m=block_m, block_k=block_k)


# ---------------------------------------------------------------------------
# Decoder kernel: h = z_i * z_j -> Linear+ReLU -> Linear+ReLU -> Linear(2)
# ---------------------------------------------------------------------------
def _mlp_decoder_kernel(zi_ref, zj_ref,
                        w1_ref, b1_ref,
                        w2_ref, b2_ref,
                        w3_ref, b3_ref,
                        out_ref):
    # Element-wise product in f32 (v5e's VPU has no bf16 ALUs).
    h = zi_ref[...].astype(jnp.float32) * zj_ref[...].astype(jnp.float32)

    # layer 1: bf16 x bf16 MXU matmul, f32 accumulation; bias + ReLU in f32.
    h = jnp.dot(h.astype(w1_ref.dtype), w1_ref[...],
                preferred_element_type=jnp.float32)
    h = jnp.maximum(h + b1_ref[...], 0.0)

    # layer 2
    h = jnp.dot(h.astype(w2_ref.dtype), w2_ref[...],
                preferred_element_type=jnp.float32)
    h = jnp.maximum(h + b2_ref[...], 0.0)

    # layer 3: W3 is zero-padded to 128 output lanes for the MXU, but only the
    # 2 live columns are stored -> HBM output is exactly (block_n, 2).
    out = jnp.dot(h.astype(w3_ref.dtype), w3_ref[...],
                  preferred_element_type=jnp.float32) + b3_ref[...]
    out_ref[...] = out[:, :_OUT_DIM].astype(out_ref.dtype)


def _mlp_decoder_call(z_i, z_j, prep, block_n):
    n, hidden = z_i.shape
    assert z_j.shape == (n, hidden)

    # Big row blocks amortize the ~0.35 us per-grid-step overhead; per-tile
    # VMEM is only ~block_n*hidden*2 B per input so 2048 is cheap everywhere.
    if n < block_n:
        block_n = n                       # full-array block (always legal)
    grid = (pl.cdiv(n, block_n),)

    row_spec = pl.BlockSpec((block_n, hidden), lambda i: (i, 0))
    full = lambda shape: pl.BlockSpec(shape, lambda i: (0, 0))

    return pl.pallas_call(
        _mlp_decoder_kernel,
        out_shape=jax.ShapeDtypeStruct((n, _OUT_DIM), jnp.float32),
        grid_spec=pltpu.PrefetchScalarGridSpec(
            num_scalar_prefetch=0,
            grid=grid,
            in_specs=[
                row_spec,                        # z_i tile (bf16)
                row_spec,                        # z_j tile (bf16)
                full((hidden, hidden)), full((1, hidden)),    # W1, b1
                full((hidden, hidden)), full((1, hidden)),    # W2, b2
                full((hidden, _W3_PAD)), full((1, _W3_PAD)),  # W3, b3 (padded)
            ],
            out_specs=pl.BlockSpec((block_n, _OUT_DIM), lambda i: (i, 0)),
        ),
        compiler_params=pltpu.CompilerParams(
            dimension_semantics=("parallel",)),
    )(z_i, z_j, prep["w1"], prep["b1"], prep["w2"], prep["b2"],
      prep["w3"], prep["b3"])


# ---------------------------------------------------------------------------
# Parameter prep (done ONCE, outside the jitted forward).
# ---------------------------------------------------------------------------
def init_params(key, in_channels, hidden):
    """PyTorch-convention parameters for GCNEncoder + MLPDecoder."""
    ks = jax.random.split(key, 12)

    def lin(kw, kb, fan_in, fan_out):
        s = 1.0 / jnp.sqrt(fan_in)
        return (jax.random.uniform(kw, (fan_out, fan_in), jnp.float32, -s, s),
                jax.random.uniform(kb, (fan_out,), jnp.float32, -s, s))

    enc = {}
    enc["W1"], enc["b1"] = lin(ks[0], ks[1], in_channels, hidden)
    enc["W2"], enc["b2"] = lin(ks[2], ks[3], hidden, hidden)
    enc["W3"], enc["b3"] = lin(ks[4], ks[5], hidden, hidden)
    dec = {}
    dec["W1"], dec["b1"] = lin(ks[6], ks[7], hidden, hidden)
    dec["W2"], dec["b2"] = lin(ks[8], ks[9], hidden, hidden)
    dec["W3"], dec["b3"] = lin(ks[10], ks[11], hidden, _OUT_DIM)
    return enc, dec


def prepare_encoder_params(enc, compute_dtype=jnp.bfloat16):
    t = lambda w: jnp.asarray(w, jnp.float32).T.astype(compute_dtype)
    b = lambda v: jnp.asarray(v, jnp.float32).reshape(1, -1)
    return {"w1": t(enc["W1"]), "b1": b(enc["b1"]),
            "w2": t(enc["W2"]), "b2": b(enc["b2"]),
            "w3": t(enc["W3"]), "b3": b(enc["b3"])}


def prepare_decoder_params(dec, compute_dtype=jnp.bfloat16):
    hidden = dec["W1"].shape[0]
    t = lambda w: jnp.asarray(w, jnp.float32).T.astype(compute_dtype)
    b = lambda v: jnp.asarray(v, jnp.float32).reshape(1, -1)
    w3 = jnp.zeros((hidden, _W3_PAD), compute_dtype).at[:, :_OUT_DIM].set(
        jnp.asarray(dec["W3"], jnp.float32).T.astype(compute_dtype))
    b3 = jnp.zeros((1, _W3_PAD), jnp.float32).at[:, :_OUT_DIM].set(
        jnp.asarray(dec["b3"], jnp.float32).reshape(1, -1))
    return {"w1": t(dec["W1"]), "b1": b(dec["b1"]),
            "w2": t(dec["W2"]), "b2": b(dec["b2"]),
            "w3": w3, "b3": b3}


def build_norm_adj(edge_index, num_nodes, dtype=jnp.bfloat16):
    """Dense symmetric-normalized adjacency with self-loops (GCNConv
    aggregation, densified): A_hat = D^-1/2 (A + I) D^-1/2.

    Built in f32 and returned pre-cast to bf16 so the per-forward cast pass
    over N^2 elements disappears.  Duplicate edges count twice (.add), matching
    PyG's scatter-add semantics.
    """
    src, dst = edge_index
    a = jnp.zeros((num_nodes, num_nodes), jnp.float32)
    a = a.at[dst, src].add(1.0)                     # message src -> dst
    a = a + jnp.eye(num_nodes, dtype=jnp.float32)   # self-loops
    deg = jnp.sum(a, axis=1)
    d = jax.lax.rsqrt(jnp.maximum(deg, 1e-12))
    return (d[:, None] * a * d[None, :]).astype(dtype)


# ---------------------------------------------------------------------------
# Full GCNModel forward.
# ---------------------------------------------------------------------------
@functools.partial(jax.jit,
                   static_argnames=("block_n", "block_m", "block_k",
                                    "force_tiled"))
def gcn_model_forward(x, a_hat, edge_label_index, enc_prep, dec_prep,
                      block_n=2048, block_m=512, block_k=512,
                      force_tiled=False):
    a_bf16 = a_hat.astype(jnp.bfloat16)      # no-op when pre-cast (recommended)
    x_bf16 = x.astype(jnp.bfloat16)          # N*in_ch: negligible traffic

    n_nodes, in_ch = x.shape
    hidden = enc_prep["w1"].shape[1]
    vmem_est = _fused_encoder_vmem_bytes(n_nodes, in_ch, hidden)
    if force_tiled or vmem_est > _FUSED_VMEM_BUDGET:
        z = _gcn_encoder_tiled(a_bf16, x_bf16, enc_prep, jnp.bfloat16,
                               block_m, block_k)
    else:
        z = _gcn_encoder_fused_call(x_bf16, a_bf16, enc_prep,
                                    z_dtype=jnp.bfloat16, vmem_est=vmem_est)

    # TODO(synk): for large edge counts, fuse the z[src]/z[dst] gather into the
    # decoder (scalar-prefetch indices + in-kernel gather on a resident z) to
    # avoid the XLA materialization round-trip; jnp.take is fine at small n.
    src, dst = edge_label_index
    z_src = jnp.take(z, src, axis=0)
    z_dst = jnp.take(z, dst, axis=0)

    return _mlp_decoder_call(z_src, z_dst, dec_prep, block_n)


# ---------------------------------------------------------------------------
# Pure-JAX reference mirroring the kernels' precision choices
# (bf16 matmul operands, f32 accumulation, (A@H)@W association, bf16 z).
# ---------------------------------------------------------------------------
def reference_forward(x, a_hat, edge_label_index, enc, dec):
    q = lambda v: v.astype(jnp.bfloat16).astype(jnp.float32)
    a = q(a_hat)

    def gcn_layer(h, W, b, relu):
        ah = q(a @ q(h))                     # A(bf16) @ H(bf16), f32 acc, -> bf16
        u = ah @ q(W.T) + b
        return jax.nn.relu(u) if relu else u

    h = gcn_layer(x, enc["W1"], enc["b1"], True)
    h = gcn_layer(h, enc["W2"], enc["b2"], True)
    z = q(gcn_layer(h, enc["W3"], enc["b3"], False))

    src, dst = edge_label_index
    h = z[src] * z[dst]
    h = jax.nn.relu(q(h) @ q(dec["W1"].T) + dec["b1"])
    h = jax.nn.relu(q(h) @ q(dec["W2"].T) + dec["b2"])
    return q(h) @ q(dec["W3"].T) + dec["b3"]


# ---------------------------------------------------------------------------
# Self-test.
# ---------------------------------------------------------------------------
def _make_graph(key, num_nodes, num_edges, num_pairs):
    k_e, k_o, k_l = jax.random.split(key, 3)
    e_src = jax.random.randint(k_e, (num_edges,), 0, num_nodes)
    e_off = jax.random.randint(k_o, (num_edges,), 0, num_nodes - 1)
    e_dst = (e_src + 1 + e_off) % num_nodes          # no self-loops
    edge_index = jnp.stack([jnp.concatenate([e_src, e_dst]),
                            jnp.concatenate([e_dst, e_src])]).astype(jnp.int32)
    edge_label_index = jax.random.randint(
        k_l, (2, num_pairs), 0, num_nodes).astype(jnp.int32)
    return edge_index, edge_label_index


def _run_case(key, num_nodes, in_channels, hidden, num_edges, num_pairs,
              **fwd_kw):
    k_x, k_g, k_p = jax.random.split(key, 3)
    x = jax.random.normal(k_x, (num_nodes, in_channels), jnp.float32)
    edge_index, edge_label_index = _make_graph(k_g, num_nodes, num_edges,
                                               num_pairs)
    enc, dec = init_params(k_p, in_channels, hidden)
    enc_prep = prepare_encoder_params(enc)       # once, outside the jit
    dec_prep = prepare_decoder_params(dec)       # once, outside the jit
    a_hat = build_norm_adj(edge_index, num_nodes)  # bf16, once, outside the jit

    out = gcn_model_forward(x, a_hat, edge_label_index, enc_prep, dec_prep,
                            **fwd_kw)
    out = jax.block_until_ready(out)

    ref = reference_forward(x, a_hat, edge_label_index, enc, dec)
    assert out.shape == (num_pairs, _OUT_DIM), out.shape
    max_err = jnp.max(jnp.abs(out - ref))
    assert jnp.allclose(out, ref, atol=3e-3, rtol=3e-3), max_err


if __name__ == "__main__":
    key = jax.random.PRNGKey(0)
    k1, k2 = jax.random.split(key)

    # Small graph -> fused single-shot encoder path (A resident in VMEM).
    _run_case(k1, num_nodes=16, in_channels=8, hidden=32,
              num_edges=24, num_pairs=8)

    # Medium graph -> tiled encoder path (parallel row axis + K reduction).
    _run_case(k2, num_nodes=256, in_channels=8, hidden=32,
              num_edges=512, num_pairs=64,
              force_tiled=True, block_m=128, block_k=128)

    print("KERNEL_OK")
</pallas_src>

<mosaic_0001>
module attributes {stable_mosaic.version = 11 : i64} {
  func.func @_gcn_encoder_fused_kernel(%arg0: i32, %arg1: memref<16x16xbf16, #tpu.memory_space<vmem>>, %arg2: memref<16x8xbf16, #tpu.memory_space<vmem>>, %arg3: memref<8x32xbf16, #tpu.memory_space<vmem>>, %arg4: memref<1x32xf32, #tpu.memory_space<vmem>>, %arg5: memref<32x32xbf16, #tpu.memory_space<vmem>>, %arg6: memref<1x32xf32, #tpu.memory_space<vmem>>, %arg7: memref<32x32xbf16, #tpu.memory_space<vmem>>, %arg8: memref<1x32xf32, #tpu.memory_space<vmem>>, %arg9: memref<16x32xbf16, #tpu.memory_space<vmem>>) attributes {dimension_semantics = [#tpu.dimension_semantics<arbitrary>], iteration_bounds = array<i64: 1>, scalar_prefetch = 0 : i64, scratch_operands = 0 : i64, tpu.core_type = #tpu.core_type<tc>, window_params = [{pipeline_mode = #tpu.pipeline_mode<synchronous>, transform_indices = @transform_0, window_bounds = array<i64: 16, 16>}, {pipeline_mode = #tpu.pipeline_mode<synchronous>, transform_indices = @transform_1, window_bounds = array<i64: 16, 8>}, {pipeline_mode = #tpu.pipeline_mode<synchronous>, transform_indices = @transform_2, window_bounds = array<i64: 8, 32>}, {pipeline_mode = #tpu.pipeline_mode<synchronous>, transform_indices = @transform_3, window_bounds = array<i64: 1, 32>}, {pipeline_mode = #tpu.pipeline_mode<synchronous>, transform_indices = @transform_4, window_bounds = array<i64: 32, 32>}, {pipeline_mode = #tpu.pipeline_mode<synchronous>, transform_indices = @transform_5, window_bounds = array<i64: 1, 32>}, {pipeline_mode = #tpu.pipeline_mode<synchronous>, transform_indices = @transform_6, window_bounds = array<i64: 32, 32>}, {pipeline_mode = #tpu.pipeline_mode<synchronous>, transform_indices = @transform_7, window_bounds = array<i64: 1, 32>}, {pipeline_mode = #tpu.pipeline_mode<synchronous>, transform_indices = @transform_8, window_bounds = array<i64: 16, 32>}]} {
    %c0 = arith.constant 0 : index
    %c0_0 = arith.constant 0 : index
    %0 = vector.load %arg1[%c0, %c0_0] : memref<16x16xbf16, #tpu.memory_space<vmem>>, vector<16x16xbf16>
    %c0_1 = arith.constant 0 : index
    %c0_2 = arith.constant 0 : index
    %1 = vector.load %arg2[%c0_1, %c0_2] : memref<16x8xbf16, #tpu.memory_space<vmem>>, vector<16x8xbf16>
    %cst = arith.constant dense<0.000000e+00> : vector<16x8xf32>
    %2 = tpu.matmul %0, %1, %cst {dimension_numbers = #tpu.dot_dimension_numbers<[1], [0], [0], [1], [0, 0, 1, 1], [], []>} : vector<16x16xbf16>, vector<16x8xbf16>, vector<16x8xf32> -> vector<16x8xf32>
    %3 = arith.truncf %2 : vector<16x8xf32> to vector<16x8xbf16>
    %c0_3 = arith.constant 0 : index
    %c0_4 = arith.constant 0 : index
    %4 = vector.load %arg3[%c0_3, %c0_4] : memref<8x32xbf16, #tpu.memory_space<vmem>>, vector<8x32xbf16>
    %cst_5 = arith.constant dense<0.000000e+00> : vector<16x32xf32>
    %5 = tpu.matmul %3, %4, %cst_5 {dimension_numbers = #tpu.dot_dimension_numbers<[1], [0], [0], [1], [0, 0, 1, 1], [], []>} : vector<16x8xbf16>, vector<8x32xbf16>, vector<16x32xf32> -> vector<16x32xf32>
    %c0_6 = arith.constant 0 : index
    %c0_7 = arith.constant 0 : index
    %6 = vector.load %arg4[%c0_6, %c0_7] : memref<1x32xf32, #tpu.memory_space<vmem>>, vector<1x32xf32>
    %7 = vector.broadcast %6 : vector<1x32xf32> to vector<16x32xf32>
    %8 = arith.addf %5, %7 : vector<16x32xf32>
    %cst_8 = arith.constant 0.000000e+00 : f32
    %9 = vector.broadcast %cst_8 : f32 to vector<16x32xf32>
    %10 = arith.maximumf %8, %9 : vector<16x32xf32>
    %11 = arith.truncf %10 : vector<16x32xf32> to vector<16x32xbf16>
    %cst_9 = arith.constant dense<0.000000e+00> : vector<16x32xf32>
    %12 = tpu.matmul %0, %11, %cst_9 {dimension_numbers = #tpu.dot_dimension_numbers<[1], [0], [0], [1], [0, 0, 1, 1], [], []>} : vector<16x16xbf16>, vector<16x32xbf16>, vector<16x32xf32> -> vector<16x32xf32>
    %13 = arith.truncf %12 : vector<16x32xf32> to vector<16x32xbf16>
    %c0_10 = arith.constant 0 : index
    %c0_11 = arith.constant 0 : index
    %14 = vector.load %arg5[%c0_10, %c0_11] : memref<32x32xbf16, #tpu.memory_space<vmem>>, vector<32x32xbf16>
    %cst_12 = arith.constant dense<0.000000e+00> : vector<16x32xf32>
    %15 = tpu.matmul %13, %14, %cst_12 {dimension_numbers = #tpu.dot_dimension_numbers<[1], [0], [0], [1], [0, 0, 1, 1], [], []>} : vector<16x32xbf16>, vector<32x32xbf16>, vector<16x32xf32> -> vector<16x32xf32>
    %c0_13 = arith.constant 0 : index
    %c0_14 = arith.constant 0 : index
    %16 = vector.load %arg6[%c0_13, %c0_14] : memref<1x32xf32, #tpu.memory_space<vmem>>, vector<1x32xf32>
    %17 = vector.broadcast %16 : vector<1x32xf32> to vector<16x32xf32>
    %18 = arith.addf %15, %17 : vector<16x32xf32>
    %cst_15 = arith.constant 0.000000e+00 : f32
    %19 = vector.broadcast %cst_15 : f32 to vector<16x32xf32>
    %20 = arith.maximumf %18, %19 : vector<16x32xf32>
    %21 = arith.truncf %20 : vector<16x32xf32> to vector<16x32xbf16>
    %cst_16 = arith.constant dense<0.000000e+00> : vector<16x32xf32>
    %22 = tpu.matmul %0, %21, %cst_16 {dimension_numbers = #tpu.dot_dimension_numbers<[1], [0], [0], [1], [0, 0, 1, 1], [], []>} : vector<16x16xbf16>, vector<16x32xbf16>, vector<16x32xf32> -> vector<16x32xf32>
    %23 = arith.truncf %22 : vector<16x32xf32> to vector<16x32xbf16>
    %c0_17 = arith.constant 0 : index
    %c0_18 = arith.constant 0 : index
    %24 = vector.load %arg7[%c0_17, %c0_18] : memref<32x32xbf16, #tpu.memory_space<vmem>>, vector<32x32xbf16>
    %cst_19 = arith.constant dense<0.000000e+00> : vector<16x32xf32>
    %25 = tpu.matmul %23, %24, %cst_19 {dimension_numbers = #tpu.dot_dimension_numbers<[1], [0], [0], [1], [0, 0, 1, 1], [], []>} : vector<16x32xbf16>, vector<32x32xbf16>, vector<16x32xf32> -> vector<16x32xf32>
    %c0_20 = arith.constant 0 : index
    %c0_21 = arith.constant 0 : index
    %26 = vector.load %arg8[%c0_20, %c0_21] : memref<1x32xf32, #tpu.memory_space<vmem>>, vector<1x32xf32>
    %27 = vector.broadcast %26 : vector<1x32xf32> to vector<16x32xf32>
    %28 = arith.addf %25, %27 : vector<16x32xf32>
    %29 = arith.truncf %28 : vector<16x32xf32> to vector<16x32xbf16>
    %c0_22 = arith.constant 0 : index
    %c0_23 = arith.constant 0 : index
    %30 = vector.load %arg9[%c0_22, %c0_23] : memref<16x32xbf16, #tpu.memory_space<vmem>>, vector<16x32xbf16>
    tpu.vector_store %arg9[%c0_22, %c0_23], %29 {strides = array<i32>} : memref<16x32xbf16, #tpu.memory_space<vmem>>, vector<16x32xbf16>,
    return
  }
  func.func @transform_0(%arg0: i32) -> (i32, i32) {
    %c0_i32 = arith.constant 0 : i32
    %c0_i32_0 = arith.constant 0 : i32
    %c0_i32_1 = arith.constant 0 : i32
    return %c0_i32, %c0_i32_0 : i32, i32
  }
  func.func @transform_1(%arg0: i32) -> (i32, i32) {
    %c0_i32 = arith.constant 0 : i32
    %c0_i32_0 = arith.constant 0 : i32
    %c0_i32_1 = arith.constant 0 : i32
    return %c0_i32, %c0_i32_0 : i32, i32
  }
  func.func @transform_2(%arg0: i32) -> (i32, i32) {
    %c0_i32 = arith.constant 0 : i32
    %c0_i32_0 = arith.constant 0 : i32
    %c0_i32_1 = arith.constant 0 : i32
    return %c0_i32, %c0_i32_0 : i32, i32
  }
  func.func @transform_3(%arg0: i32) -> (i32, i32) {
    %c0_i32 = arith.constant 0 : i32
    %c0_i32_0 = arith.constant 0 : i32
    %c0_i32_1 = arith.constant 0 : i32
    return %c0_i32, %c0_i32_0 : i32, i32
  }
  func.func @transform_4(%arg0: i32) -> (i32, i32) {
    %c0_i32 = arith.constant 0 : i32
    %c0_i32_0 = arith.constant 0 : i32
    %c0_i32_1 = arith.constant 0 : i32
    return %c0_i32, %c0_i32_0 : i32, i32
  }
  func.func @transform_5(%arg0: i32) -> (i32, i32) {
    %c0_i32 = arith.constant 0 : i32
    %c0_i32_0 = arith.constant 0 : i32
    %c0_i32_1 = arith.constant 0 : i32
    return %c0_i32, %c0_i32_0 : i32, i32
  }
  func.func @transform_6(%arg0: i32) -> (i32, i32) {
    %c0_i32 = arith.constant 0 : i32
    %c0_i32_0 = arith.constant 0 : i32
    %c0_i32_1 = arith.constant 0 : i32
    return %c0_i32, %c0_i32_0 : i32, i32
  }
  func.func @transform_7(%arg0: i32) -> (i32, i32) {
    %c0_i32 = arith.constant 0 : i32
    %c0_i32_0 = arith.constant 0 : i32
    %c0_i32_1 = arith.constant 0 : i32
    return %c0_i32, %c0_i32_0 : i32, i32
  }
  func.func @transform_8(%arg0: i32) -> (i32, i32) {
    %c0_i32 = arith.constant 0 : i32
    %c0_i32_0 = arith.constant 0 : i32
    %c0_i32_1 = arith.constant 0 : i32
    return %c0_i32, %c0_i32_0 : i32, i32
  }
}

module attributes {stable_mosaic.version = 11 : i64} {
  func.func @_mlp_decoder_kernel(%arg0: i32, %arg1: memref<8x32xbf16, #tpu.memory_space<vmem>>, %arg2: memref<8x32xbf16, #tpu.memory_space<vmem>>, %arg3: memref<32x32xbf16, #tpu.memory_space<vmem>>, %arg4: memref<1x32xf32, #tpu.memory_space<vmem>>, %arg5: memref<32x32xbf16, #tpu.memory_space<vmem>>, %arg6: memref<1x32xf32, #tpu.memory_space<vmem>>, %arg7: memref<32x128xbf16, #tpu.memory_space<vmem>>, %arg8: memref<1x128xf32, #tpu.memory_space<vmem>>, %arg9: memref<8x2xf32, #tpu.memory_space<vmem>>) attributes {dimension_semantics = [#tpu.dimension_semantics<parallel>], iteration_bounds = array<i64: 1>, scalar_prefetch = 0 : i64, scratch_operands = 0 : i64, tpu.core_type = #tpu.core_type<tc>, window_params = [{transform_indices = @transform_0, window_bounds = array<i64: 8, 32>}, {transform_indices = @transform_1, window_bounds = array<i64: 8, 32>}, {pipeline_mode = #tpu.pipeline_mode<synchronous>, transform_indices = @transform_2, window_bounds = array<i64: 32, 32>}, {pipeline_mode = #tpu.pipeline_mode<synchronous>, transform_indices = @transform_3, window_bounds = array<i64: 1, 32>}, {pipeline_mode = #tpu.pipeline_mode<synchronous>, transform_indices = @transform_4, window_bounds = array<i64: 32, 32>}, {pipeline_mode = #tpu.pipeline_mode<synchronous>, transform_indices = @transform_5, window_bounds = array<i64: 1, 32>}, {pipeline_mode = #tpu.pipeline_mode<synchronous>, transform_indices = @transform_6, window_bounds = array<i64: 32, 128>}, {pipeline_mode = #tpu.pipeline_mode<synchronous>, transform_indices = @transform_7, window_bounds = array<i64: 1, 128>}, {transform_indices = @transform_8, window_bounds = array<i64: 8, 2>}]} {
    %c0 = arith.constant 0 : index
    %c0_0 = arith.constant 0 : index
    %0 = vector.load %arg1[%c0, %c0_0] : memref<8x32xbf16, #tpu.memory_space<vmem>>, vector<8x32xbf16>
    %1 = arith.extf %0 : vector<8x32xbf16> to vector<8x32xf32>
    %c0_1 = arith.constant 0 : index
    %c0_2 = arith.constant 0 : index
    %2 = vector.load %arg2[%c0_1, %c0_2] : memref<8x32xbf16, #tpu.memory_space<vmem>>, vector<8x32xbf16>
    %3 = arith.extf %2 : vector<8x32xbf16> to vector<8x32xf32>
    %4 = arith.mulf %1, %3 : vector<8x32xf32>
    %5 = arith.truncf %4 : vector<8x32xf32> to vector<8x32xbf16>
    %c0_3 = arith.constant 0 : index
    %c0_4 = arith.constant 0 : index
    %6 = vector.load %arg3[%c0_3, %c0_4] : memref<32x32xbf16, #tpu.memory_space<vmem>>, vector<32x32xbf16>
    %cst = arith.constant dense<0.000000e+00> : vector<8x32xf32>
    %7 = tpu.matmul %5, %6, %cst {dimension_numbers = #tpu.dot_dimension_numbers<[1], [0], [0], [1], [0, 0, 1, 1], [], []>} : vector<8x32xbf16>, vector<32x32xbf16>, vector<8x32xf32> -> vector<8x32xf32>
    %c0_5 = arith.constant 0 : index
    %c0_6 = arith.constant 0 : index
    %8 = vector.load %arg4[%c0_5, %c0_6] : memref<1x32xf32, #tpu.memory_space<vmem>>, vector<1x32xf32>
    %9 = vector.broadcast %8 : vector<1x32xf32> to vector<8x32xf32>
    %10 = arith.addf %7, %9 : vector<8x32xf32>
    %cst_7 = arith.constant 0.000000e+00 : f32
    %11 = vector.broadcast %cst_7 : f32 to vector<8x32xf32>
    %12 = arith.maximumf %10, %11 : vector<8x32xf32>
    %13 = arith.truncf %12 : vector<8x32xf32> to vector<8x32xbf16>
    %c0_8 = arith.constant 0 : index
    %c0_9 = arith.constant 0 : index
    %14 = vector.load %arg5[%c0_8, %c0_9] : memref<32x32xbf16, #tpu.memory_space<vmem>>, vector<32x32xbf16>
    %cst_10 = arith.constant dense<0.000000e+00> : vector<8x32xf32>
    %15 = tpu.matmul %13, %14, %cst_10 {dimension_numbers = #tpu.dot_dimension_numbers<[1], [0], [0], [1], [0, 0, 1, 1], [], []>} : vector<8x32xbf16>, vector<32x32xbf16>, vector<8x32xf32> -> vector<8x32xf32>
    %c0_11 = arith.constant 0 : index
    %c0_12 = arith.constant 0 : index
    %16 = vector.load %arg6[%c0_11, %c0_12] : memref<1x32xf32, #tpu.memory_space<vmem>>, vector<1x32xf32>
    %17 = vector.broadcast %16 : vector<1x32xf32> to vector<8x32xf32>
    %18 = arith.addf %15, %17 : vector<8x32xf32>
    %cst_13 = arith.constant 0.000000e+00 : f32
    %19 = vector.broadcast %cst_13 : f32 to vector<8x32xf32>
    %20 = arith.maximumf %18, %19 : vector<8x32xf32>
    %21 = arith.truncf %20 : vector<8x32xf32> to vector<8x32xbf16>
    %c0_14 = arith.constant 0 : index
    %c0_15 = arith.constant 0 : index
    %22 = vector.load %arg7[%c0_14, %c0_15] : memref<32x128xbf16, #tpu.memory_space<vmem>>, vector<32x128xbf16>
    %cst_16 = arith.constant dense<0.000000e+00> : vector<8x128xf32>
    %23 = tpu.matmul %21, %22, %cst_16 {dimension_numbers = #tpu.dot_dimension_numbers<[1], [0], [0], [1], [0, 0, 1, 1], [], []>} : vector<8x32xbf16>, vector<32x128xbf16>, vector<8x128xf32> -> vector<8x128xf32>
    %c0_17 = arith.constant 0 : index
    %c0_18 = arith.constant 0 : index
    %24 = vector.load %arg8[%c0_17, %c0_18] : memref<1x128xf32, #tpu.memory_space<vmem>>, vector<1x128xf32>
    %25 = vector.broadcast %24 : vector<1x128xf32> to vector<8x128xf32>
    %26 = arith.addf %23, %25 : vector<8x128xf32>
    %27 = vector.extract_strided_slice %26 {offsets = [0, 0], sizes = [8, 2], strides = [1, 1]} : vector<8x128xf32> to vector<8x2xf32>
    %c0_19 = arith.constant 0 : index
    %c0_20 = arith.constant 0 : index
    %28 = vector.load %arg9[%c0_19, %c0_20] : memref<8x2xf32, #tpu.memory_space<vmem>>, vector<8x2xf32>
    tpu.vector_store %arg9[%c0_19, %c0_20], %27 {strides = array<i32>} : memref<8x2xf32, #tpu.memory_space<vmem>>, vector<8x2xf32>,
    return
  }
  func.func @transform_0(%arg0: i32) -> (i32, i32) {
    %c0_i32 = arith.constant 0 : i32
    %c0_i32_0 = arith.constant 0 : i32
    return %arg0, %c0_i32 : i32, i32
  }
  func.func @transform_1(%arg0: i32) -> (i32, i32) {
    %c0_i32 = arith.constant 0 : i32
    %c0_i32_0 = arith.constant 0 : i32
    return %arg0, %c0_i32 : i32, i32
  }
  func.func @transform_2(%arg0: i32) -> (i32, i32) {
    %c0_i32 = arith.constant 0 : i32
    %c0_i32_0 = arith.constant 0 : i32
    %c0_i32_1 = arith.constant 0 : i32
    return %c0_i32, %c0_i32_0 : i32, i32
  }
  func.func @transform_3(%arg0: i32) -> (i32, i32) {
    %c0_i32 = arith.constant 0 : i32
    %c0_i32_0 = arith.constant 0 : i32
    %c0_i32_1 = arith.constant 0 : i32
    return %c0_i32, %c0_i32_0 : i32, i32
  }
  func.func @transform_4(%arg0: i32) -> (i32, i32) {
    %c0_i32 = arith.constant 0 : i32
    %c0_i32_0 = arith.constant 0 : i32
    %c0_i32_1 = arith.constant 0 : i32
    return %c0_i32, %c0_i32_0 : i32, i32
  }
  func.func @transform_5(%arg0: i32) -> (i32, i32) {
    %c0_i32 = arith.constant 0 : i32
    %c0_i32_0 = arith.constant 0 : i32
    %c0_i32_1 = arith.constant 0 : i32
    return %c0_i32, %c0_i32_0 : i32, i32
  }
  func.func @transform_6(%arg0: i32) -> (i32, i32) {
    %c0_i32 = arith.constant 0 : i32
    %c0_i32_0 = arith.constant 0 : i32
    %c0_i32_1 = arith.constant 0 : i32
    return %c0_i32, %c0_i32_0 : i32, i32
  }
  func.func @transform_7(%arg0: i32) -> (i32, i32) {
    %c0_i32 = arith.constant 0 : i32
    %c0_i32_0 = arith.constant 0 : i32
    %c0_i32_1 = arith.constant 0 : i32
    return %c0_i32, %c0_i32_0 : i32, i32
  }
  func.func @transform_8(%arg0: i32) -> (i32, i32) {
    %c0_i32 = arith.constant 0 : i32
    %c0_i32_0 = arith.constant 0 : i32
    return %arg0, %c0_i32 : i32, i32
  }
}

</mosaic_0001>

<bundles_post_ra>
// kernel: gcn_model_forward.3
= control target key start
LH: loop header
LB: loop body
LE: loop exit
PB: predicated region body
PF: predicated region fallthrough
CT: control target
= control target key end

     0   :  { %v298_v0 = vmov 0.0   ;;  %vm299_vm0 = vmmov 0   ;;  %vm59_vm1 = vcmask 261120   ;;  %vm239_vm2 = vcmask 15360   ;;  %s387_s2 = inlined_call_operand.vmem [shape: bf16[32,32], index: 2, kind: input, shape index: {}]   ;;  %s388_s0 = inlined_call_operand.vmem [shape: bf16[8,32], index: 0, kind: input, shape index: {}]   ;;  %s389_s1 = inlined_call_operand.vmem [shape: bf16[8,32], index: 1, kind: input, shape index: {}]   ;;  %s390_s4 = inlined_call_operand.vmem [shape: bf16[32,32], index: 4, kind: input, shape index: {}]   ;;  %s391_s6 = inlined_call_operand.vmem [shape: bf16[32,128], index: 6, kind: input, shape index: {}]   ;;  %s392_s3 = inlined_call_operand.vmem [shape: f32[1,32], index: 3, kind: input, shape index: {}]   ;;  %s393_s5 = inlined_call_operand.vmem [shape: f32[1,32], index: 5, kind: input, shape index: {}]   ;;  %s394_s7 = inlined_call_operand.vmem [shape: f32[1,128], index: 7, kind: input, shape index: {}]   ;;  %s395_s8 = inlined_call_operand.vmem [shape: f32[8,2], index: 8, kind: output, shape index: {}]  }
   0x1   :  { %266 = vmatprep.subr.bf16.mxu0 %v298_v0  ;;  %v292_v1 = vld [vmem:[%s387_s2] sm:$0xff]   ;;  %270 = vmatprep.mubr.msk.bf16.mxu0 %vm299_vm0, %v298_v0  ;;  %v293_v2 = vld [vmem:[%s387_s2 + $0x8] sm:$0xff]  }
   0x2   :  { %274 = vmatprep.subr.bf16.mxu1 %v298_v0  ;;  %278 = vmatprep.mubr.msk.bf16.mxu1 %vm299_vm0, %v298_v0  ;;  %v30_v3 = vld [vmem:[%s388_s0] sm:$0xf]  ;;  %v295_v10 = vld [vmem:[%s390_s4 + $0x8] sm:$0xff]  }
   0x3   :  { %267 = vmatpush3.bf16.msra.mxu0 %v292_v1  ;;  %v32_v4 = vld [vmem:[%s389_s1] sm:$0xf]  ;;  %v31_v5 = vunpack.c.l.bf16 %v30_v3  ;;  %v297_v20 = vld [vmem:[%s391_s6 + $0x8] sm:$0xff]  }
   0x4   :  { %268 = vmatprep.subr.bf16.mxu0 %v298_v0  ;;  %v33_v6 = vunpack.c.l.bf16 %v32_v4  ;;  %v294_v9 = vld [vmem:[%s390_s4] sm:$0xff]  }
   0x5   :  { %275 = vmatpush3.bf16.msra.mxu1 %v294_v9  ;;  %v296_v11 = vld [vmem:[%s391_s6] sm:$0xff]  }
   0x6   :  { %v34_v7 = vmul.f32 %v33_v6, %v31_v5  ;;  %276 = vmatprep.subr.bf16.mxu1 %v298_v0  ;;  %v245_v12 = vld [vmem:[%s392_s3] ss:$0 sm:$0xff] }
   0x7   :  { %269 = vmatpush3.bf16.msra.mxu0 %v293_v2  ;;  %v249_v21 = vld [vmem:[%s393_s5] ss:$0 sm:$0xff] }
   0x8   :  { %v35_v8 = vpack.c.bf16 %v34_v7, %v34_v7  ;;  %282 = vmatprep.subr.bf16.mxu0 %v298_v0  ;;  %v253_v29 = vld [vmem:[%s394_s7] ss:$0 sm:$0xff] }
   0x9   :  { %277 = vmatpush3.bf16.msra.mxu1 %v295_v10 }
   0xa   :  { %271 = vmatmul.mubr.msk.bf16.vlgmr.msra.gmra.mrb[0].mxu0 %vm59_vm1, %v35_v8 }
   0xb   :  { %286 = vmatprep.mubr.msk.bf16.mxu0 %vm299_vm0, %v298_v0  ;;  %283 = vmatpush3.bf16.msra.mxu0 %v296_v11 }
   0xc   :  { %284 = vmatprep.subr.bf16.mxu0 %v298_v0 }
   0xf   :  { %285 = vmatpush3.bf16.msra.mxu0 %v297_v20 }
  0xdd   :  { %v97_v13 = vpop.f32.mrb[0].mxu0 }
  0xde   :  { %v98_v14 = vadd.f32 %v245_v12, %v97_v13  ;;  %v272_v15 = vpop.f32.mrb[1].mxu0 }
  0xdf   :  { %v100_v16 = vpop.f32.mrb[2].mxu0 }
  0xe0   :  { %v103_v17 = vmax.f32 %v98_v14, 0.0  ;;  %v273_v18 = vpop.f32.mrb[3].mxu0 }
  0xe2   :  { %v104_v19 = vpack.c.bf16 %v103_v17, %v103_v17 }
  0xe4   :  { %279 = vmatmul.mubr.msk.bf16.vlgmr.msra.gmra.mrb[0].mxu1 %vm59_vm1, %v104_v19 }
 0x1b7   :  { %v165_v22 = vpop.f32.mrb[0].mxu1 }
 0x1b8   :  { %v166_v23 = vadd.f32 %v249_v21, %v165_v22  ;;  %v280_v24 = vpop.f32.mrb[1].mxu1 }
 0x1b9   :  { %v168_v25 = vpop.f32.mrb[2].mxu1 }
 0x1ba   :  { %v171_v26 = vmax.f32 %v166_v23, 0.0  ;;  %v281_v27 = vpop.f32.mrb[3].mxu1 }
 0x1bc   :  { %v172_v28 = vpack.c.bf16 %v171_v26, %v171_v26 }
 0x1be   :  { %287 = vmatmul.mubr.msk.bf16.vlgmr.msra.gmra.mrb[4].mxu0 %vm59_vm1, %v172_v28 }
 0x291   :  { %v233_v30 = vpop.f32.mrb[4].mxu0 }
 0x292   :  { %v234_v31 = vadd.f32 %v253_v29, %v233_v30  ;;  %v288_v32 = vpop.f32.mrb[5].mxu0 }
 0x293   :  { %v236_v33 = vpop.f32.mrb[6].mxu0 }
 0x294   :  { %240 = vst.msk [vmem:[%s395_s8] sm:$0xff] %vm239_vm2, %v234_v31  ;;  %v289_v34 = vpop.f32.mrb[7].mxu0 }

// kernel: gcn_model_forward.2
= control target key start
LH: loop header
LB: loop body
LE: loop exit
PB: predicated region body
PF: predicated region fallthrough
CT: control target
= control target key end

     0   :  { %13 = vsyncpa [#allocation3], 0  ;;  %s511_s27 = smov [#allocation2]   ;;  %s617_s0 = inlined_call_operand.hbm [shape: bf16[16,16], index: 0, kind: input, shape index: {}]   ;;  %s618_s1 = inlined_call_operand.vmem [shape: bf16[16,8], index: 1, kind: input, shape index: {}]   ;;  %s619_s2 = inlined_call_operand.vmem [shape: bf16[8,32], index: 2, kind: input, shape index: {}]   ;;  %s620_s3 = inlined_call_operand.vmem [shape: f32[1,32], index: 3, kind: input, shape index: {}]   ;;  %s621_s4 = inlined_call_operand.vmem [shape: bf16[32,32], index: 4, kind: input, shape index: {}]   ;;  %s622_s5 = inlined_call_operand.vmem [shape: f32[1,32], index: 5, kind: input, shape index: {}]   ;;  %s623_s6 = inlined_call_operand.vmem [shape: bf16[32,32], index: 6, kind: input, shape index: {}]   ;;  %s624_s7 = inlined_call_operand.vmem [shape: f32[1,32], index: 7, kind: input, shape index: {}]   ;;  %s625_s8 = inlined_call_operand.vmem [shape: bf16[16,32], index: 8, kind: output, shape index: {}]  }
   0x1   :  { %s19_s28 = sshll.u32 %s511_s27, 4  ;;  %s487_s9 = scalar_lea.hbm %s617_s0, 128  ;;  %s20_s28 = int_to_ptr.vmem [resolvable:$true] %s19_s28 }
   0x2   :  { %p488_p0 = scmp.ne.s32.totalorder %s617_s0, %s487_s9  ;;  %p491_p1 = scmp.lt.u32.totalorder %s487_s9, %s617_s0 }
   0x4   :  { %p493_p2 = pnand %p491_p1, %p488_p0 }
   0x6   :  { %496 = shalt.err (!%p493_p2)
}
   0x7   :  { %s497_s14 = scalar_lea.vmem %s20_s28, 128  ;;  %p502_p4 = scmp.lt.s32.totalorder %s20_s28, %s20_s28 }
   0x8   :  { %p498_p3 = scmp.ne.s32.totalorder %s20_s28, %s497_s14  ;;  %p503_p5 = scmp.lt.s32.totalorder %s497_s14, %s497_s14 }
   0xa   :  { %p504_p6 = por %p503_p5, %p502_p4 }
   0xc   :  { %p505_p7 = pnand %p504_p6, %p498_p3 }
   0xe   :  { %508 = shalt.err (!%p505_p7)
}
   0xf   :  { %s512_s15 = smov 64   ;;  %s513_s16 = smov 4  }
  0x10   :  { %25 = dma.hbm_to_vmem [thread:$0]  %s617_s0, 128, %s20_s28, [#allocation3], %s512_s15, %s512_s15, %s513_s16  }
  0x11   :  { %509 = dma.done.wait [#allocation3], 128  }
  0x12   :  { %510 = vsyncadd [#allocation3], 4294967168  ;;  %v514_v0 = vmov 0.0   ;;  %vm515_vm0 = vmmov 0   ;;  %v481_v1 = vld [vmem:[%s618_s1] sm:$0xff]   ;;  %vm59_vm1 = vcmask 130048  }
  0x13   :  { %436 = vmatprep.subr.bf16.mxu0 %v514_v0  ;;  %438 = vmatprep.mubr.msk.bf16.mxu0 %vm515_vm0, %v514_v0  ;;  %v482_v2 = vld [vmem:[#allocation2] sm:$0xff]   ;;  %vm117_vm2 = vcmask 1043456   ;;  %vm113_vm3 = vcmask 64512   ;;  %v484_v21 = vld [vmem:[%s621_s4 + $0x8] sm:$0xff]   ;;  %vm230_vm4 = vcmask 261120   ;;  %vm395_vm5 = vcmask 257024  }
  0x14   :  { %442 = vmatprep.subr.bf16.mxu1 %v514_v0  ;;  %444 = vmatprep.mubr.msk.bf16.mxu1 %vm515_vm0, %v514_v0  ;;  %v105_v3 = vld [vmem:[%s619_s2] sm:$0xf]  ;;  %v486_v38 = vld [vmem:[%s623_s6 + $0x8] sm:$0xff]  }
  0x15   :  { %437 = vmatpush3.bf16.msra.mxu0 %v481_v1  ;;  %v119_v4 = vsel %vm117_vm2, %v105_v3, 0  ;;  %v483_v10 = vld [vmem:[%s621_s4] sm:$0xff]  }
  0x16   :  { %448 = vmatprep.subr.bf16.mxu0 %v514_v0  ;;  %443 = vmatpush3.bf16.msra.mxu1 %v119_v4  ;;  %v406_v11 = vld [vmem:[%s620_s3] ss:$0 sm:$0xff] }
  0x17   :  { %454 = vmatprep.subr.bf16.mxu1 %v514_v0  ;;  %v485_v27 = vld [vmem:[%s623_s6] sm:$0xff]  }
  0x18   :  { %439 = vmatmul.mubr.msk.bf16.vlgmr.msra.gmra.mrb[0].mxu0 %vm59_vm1, %v482_v2  ;;  %v409_v28 = vld [vmem:[%s622_s5] ss:$0 sm:$0xff] }
  0x19   :  { %450 = vmatprep.mubr.msk.bf16.mxu0 %vm515_vm0, %v514_v0  ;;  %v414_v44 = vld [vmem:[%s624_s7] ss:$0 sm:$0xff] }
  0xeb   :  { %v97_v5 = vpop.f32.mrb[0].mxu0 }
  0xec   :  { %v440_v6 = vpop.f32.mrb[1].mxu0 }
  0xed   :  { %v100_v7 = vpop.f32.mrb[2].mxu0 }
  0xee   :  { %v104_v8 = vpack.c.bf16 %v100_v7, %v97_v5  ;;  %v441_v9 = vpop.f32.mrb[3].mxu0 }
  0xf0   :  { %445 = vmatmul.mubr.msk.bf16.vlgmr.msra.gmra.mrb[0].mxu1 %vm113_vm3, %v104_v8 }
  0xf1   :  { %458 = vmatprep.mubr.msk.bf16.mxu1 %vm515_vm0, %v514_v0  ;;  %455 = vmatpush3.bf16.msra.mxu1 %v483_v10 }
  0xf2   :  { %456 = vmatprep.subr.bf16.mxu1 %v514_v0 }
  0xf5   :  { %457 = vmatpush3.bf16.msra.mxu1 %v484_v21 }
  0xf6   :  { %468 = vmatprep.subr.bf16.mxu1 %v514_v0 }
 0x1c3   :  { %v155_v12 = vpop.f32.mrb[0].mxu1 }
 0x1c4   :  { %v156_v13 = vadd.f32 %v406_v11, %v155_v12  ;;  %v446_v14 = vpop.f32.mrb[1].mxu1 }
 0x1c5   :  { %v158_v15 = vpop.f32.mrb[2].mxu1 }
 0x1c6   :  { %v159_v16 = vadd.f32 %v406_v11, %v158_v15  ;;  %v447_v17 = vpop.f32.mrb[3].mxu1  ;;  %v162_v18 = vmax.f32 %v156_v13, 0.0 }
 0x1c8   :  { %v163_v19 = vmax.f32 %v159_v16, 0.0 }
 0x1ca   :  { %v164_v20 = vpack.c.bf16 %v163_v19, %v162_v18 }
 0x1cc   :  { %449 = vmatpush3.bf16.msra.mxu0 %v164_v20 }
 0x1cd   :  { %462 = vmatprep.subr.bf16.mxu0 %v514_v0 }
 0x1cf   :  { %451 = vmatmul.mubr.msk.bf16.vlgmr.msra.gmra.mrb[4].mxu0 %vm59_vm1, %v482_v2 }
 0x1d0   :  { %464 = vmatprep.mubr.msk.bf16.mxu0 %vm515_vm0, %v514_v0 }
 0x2a2   :  { %v199_v22 = vpop.f32.mrb[4].mxu0 }
 0x2a3   :  { %v452_v23 = vpop.f32.mrb[5].mxu0 }
 0x2a4   :  { %v202_v24 = vpop.f32.mrb[6].mxu0 }
 0x2a5   :  { %v206_v25 = vpack.c.bf16 %v202_v24, %v199_v22  ;;  %v453_v26 = vpop.f32.mrb[7].mxu0 }
 0x2a7   :  { %459 = vmatmul.mubr.msk.bf16.vlgmr.msra.gmra.mrb[4].mxu1 %vm230_vm4, %v206_v25 }
 0x2a8   :  { %472 = vmatprep.mubr.msk.bf16.mxu1 %vm515_vm0, %v514_v0  ;;  %469 = vmatpush3.bf16.msra.mxu1 %v485_v27 }
 0x2a9   :  { %470 = vmatprep.subr.bf16.mxu1 %v514_v0 }
 0x2ac   :  { %471 = vmatpush3.bf16.msra.mxu1 %v486_v38 }
 0x37a   :  { %v268_v29 = vpop.f32.mrb[4].mxu1 }
 0x37b   :  { %v269_v30 = vadd.f32 %v409_v28, %v268_v29  ;;  %v460_v31 = vpop.f32.mrb[5].mxu1 }
 0x37c   :  { %v271_v32 = vpop.f32.mrb[6].mxu1 }
 0x37d   :  { %v272_v33 = vadd.f32 %v409_v28, %v271_v32  ;;  %v461_v34 = vpop.f32.mrb[7].mxu1  ;;  %v275_v35 = vmax.f32 %v269_v30, 0.0 }
 0x37f   :  { %v276_v36 = vmax.f32 %v272_v33, 0.0 }
 0x381   :  { %v277_v37 = vpack.c.bf16 %v276_v36, %v275_v35 }
 0x383   :  { %463 = vmatpush3.bf16.msra.mxu0 %v277_v37 }
 0x386   :  { %465 = vmatmul.mubr.msk.bf16.vlgmr.msra.gmra.mrb[8].mxu0 %vm59_vm1, %v482_v2 }
 0x459   :  { %v312_v39 = vpop.f32.mrb[8].mxu0 }
 0x45a   :  { %v466_v40 = vpop.f32.mrb[9].mxu0 }
 0x45b   :  { %v315_v41 = vpop.f32.mrb[10].mxu0 }
 0x45c   :  { %v319_v42 = vpack.c.bf16 %v315_v41, %v312_v39  ;;  %v467_v43 = vpop.f32.mrb[11].mxu0 }
 0x45e   :  { %473 = vmatmul.mubr.msk.bf16.vlgmr.msra.gmra.mrb[8].mxu1 %vm230_vm4, %v319_v42 }
 0x531   :  { %v380_v45 = vpop.f32.mrb[8].mxu1 }
 0x532   :  { %v381_v46 = vadd.f32 %v414_v44, %v380_v45  ;;  %v474_v47 = vpop.f32.mrb[9].mxu1 }
 0x533   :  { %v383_v48 = vpop.f32.mrb[10].mxu1 }
 0x534   :  { %v420_v49 = vpack.c.bf16 %v381_v46, %v381_v46  ;;  %v384_v50 = vadd.f32 %v414_v44, %v383_v48  ;;  %v475_v51 = vpop.f32.mrb[11].mxu1 }
 0x536   :  { %396 = vst.msk [vmem:[%s625_s8] sm:$0xf] %vm395_vm5, %v420_v49  ;;  %v421_v52 = vpack.c.bf16 %v384_v50, %v384_v50 }
 0x538   :  { %397 = vst.msk [vmem:[%s625_s8 + $0x4] sm:$0xf] %vm395_vm5, %v421_v52 }
 0x539   :  { %402 = vsyncpa [#allocation3], 1 }

</bundles_post_ra>
